<compile_context>
chip_gen: v7x
topology: tpu7x:2x2x1
jax: 0.10.0
libtpu: 0.0.40
codegen_flags: <defaults>
</compile_context>

<pallas_src>
import functools

import numpy as np
import jax
import jax.numpy as jnp
from jax.experimental import pallas as pl
from jax.experimental.pallas import tpu as pltpu

CLIP_INPUT = 224
PATCH = 32
GRID = CLIP_INPUT // PATCH  # 7
CLIP_MEAN = (0.48145466, 0.4578275, 0.40821073)
CLIP_STD = (0.26862954, 0.26130258, 0.27577711)


def _bilinear_matrix(out_size: int, in_size: int) -> np.ndarray:
    """Interpolation matrix matching F.interpolate(mode='bilinear', align_corners=False)."""
    scale = in_size / out_size
    w = np.zeros((out_size, in_size), dtype=np.float32)
    for i in range(out_size):
        src = scale * (i + 0.5) - 0.5
        if src < 0.0:
            src = 0.0
        x0 = min(int(np.floor(src)), in_size - 1)
        x1 = x0 + 1 if x0 < in_size - 1 else x0
        lam = src - x0
        w[i, x0] += 1.0 - lam
        w[i, x1] += lam
    return w


# ----------------------------------------------------------------------------- preprocess
def _preprocess_kernel(img_ref, ry_ref, rxt_ref, bias_ref, out_ref):
    # img_ref: (Hin, Win) one channel of one image.
    # ry_ref:  (224, Hin) row-resize matrix.
    # rxt_ref: (Win, 224) column-resize matrix, pre-scaled by 1/std[c].
    # bias_ref: (C,) in SMEM holding -mean[c]/std[c].
    c = pl.program_id(1)
    tmp = jnp.dot(ry_ref[...], img_ref[...], preferred_element_type=jnp.float32)  # (224, Win)
    up = jnp.dot(tmp, rxt_ref[...], preferred_element_type=jnp.float32)           # (224, 224)
    out_ref[...] = up + bias_ref[c]                                                # norm folded in


def preprocess(img):
    n, c, hin, win = img.shape
    assert c == len(CLIP_MEAN), "expected 3-channel RGB input"
    ry = jnp.asarray(_bilinear_matrix(CLIP_INPUT, hin))                     # (224, Hin)
    rx_t = _bilinear_matrix(CLIP_INPUT, win).T                              # (Win, 224)
    inv_std = 1.0 / np.asarray(CLIP_STD, dtype=np.float32)
    # Fold 1/std into the second resize matrix; -mean/std becomes a scalar bias.
    rxts = np.stack([rx_t * s for s in inv_std], axis=0).astype(np.float32)  # (C, Win, 224)
    bias = (-np.asarray(CLIP_MEAN, dtype=np.float32) * inv_std).astype(np.float32)  # (C,)

    # TODO(synk): for very large images (e.g. 3x1080x1920) the per-channel (Hin,Win)
    # block should additionally be tiled along Win with an f32 accumulator so the
    # double-buffered image block stays under v7x's 64 MiB VMEM.
    return pl.pallas_call(
        _preprocess_kernel,
        out_shape=jax.ShapeDtypeStruct((n, c, CLIP_INPUT, CLIP_INPUT), jnp.float32),
        grid=(n, c),  # both 'parallel' -> v7x's 2nd TensorCore is used even for N=1
        in_specs=[
            pl.BlockSpec((None, None, hin, win), lambda i, ch: (i, ch, 0, 0)),
            pl.BlockSpec((CLIP_INPUT, hin), lambda i, ch: (0, 0)),
            pl.BlockSpec((None, win, CLIP_INPUT), lambda i, ch: (ch, 0, 0)),
            pl.BlockSpec(memory_space=pltpu.MemorySpace.SMEM),
        ],
        out_specs=pl.BlockSpec((None, None, CLIP_INPUT, CLIP_INPUT),
                               lambda i, ch: (i, ch, 0, 0)),
        compiler_params=pltpu.CompilerParams(
            dimension_semantics=("parallel", "parallel"),
            vmem_limit_bytes=32 * 1024 * 1024,  # actual need << 1 MiB at demo shapes
        ),
    )(img, ry, jnp.asarray(rxts), jnp.asarray(bias))


# ---------------------------------------- fused attention rollout + relevance-to-image
def _rollout_relevance_kernel(attn_ref, grad_ref, a_ref, b_ref, out_ref, *, start):
    # attn_ref / grad_ref: (L, heads, T, T) for one batch element, bf16 (or f32).
    # a_ref / b_ref: (224, T) host-built separable bilinear matrices over token index.
    num_layers, _, t, _ = attn_ref.shape

    row = jax.lax.broadcasted_iota(jnp.int32, (t, t), 0)
    col = jax.lax.broadcasted_iota(jnp.int32, (t, t), 1)
    r_init = jnp.where(row == col, 1.0, 0.0).astype(jnp.float32)            # identity

    def body(l, r):
        # Upcast narrow transport dtype to f32 before VPU math (required on v5e;
        # keeps head-mean / accumulation in f32 everywhere).
        a = attn_ref[l].astype(jnp.float32)
        g = grad_ref[l].astype(jnp.float32)
        cam = jnp.maximum(a * g, 0.0).mean(axis=0)                          # (T, T) f32
        return r + jnp.dot(cam, r, preferred_element_type=jnp.float32)

    if start < num_layers:
        # Static bounds; skipped layers (i <= relevancy_num_layers) are simply not
        # touched by the loop — no wrapper slice, no extra HBM copy.
        r = jax.lax.fori_loop(start, num_layers, body, r_init, unroll=True)
    else:
        r = r_init

    # up[o, p] = sum_t A[o, t] * B[p, t] * R[0, t]  ==  7x7 -> 224x224 bilinear upsample
    # of R[0, 1:] reshaped to (7, 7), with the CLS column zeroed inside A/B.
    scaled = b_ref[...] * r[0:1, :]                                         # (224, T)
    # Transposed-RHS contraction: avoids materializing an XLU transpose of `scaled`.
    up = jax.lax.dot_general(a_ref[...], scaled,
                             dimension_numbers=(((1,), (1,)), ((), ())),
                             preferred_element_type=jnp.float32)            # (224, 224)
    mn = jnp.min(up)
    mx = jnp.max(up)
    denom = mx - mn
    # One scalar reciprocal instead of 50K divides; guarded against a constant map.
    inv = jnp.where(denom > 0.0, 1.0 / denom, 0.0)
    out_ref[...] = (up - mn) * inv


def rollout_relevance(attn_probs, attn_grads, relevancy_num_layers):
    num_layers, batch, heads, t, _ = attn_probs.shape
    assert t == GRID * GRID + 1, "token count must be CLS + 7x7 patches"
    start = int(relevancy_num_layers) + 1

    # Guard the monolithic per-batch block against v7x's 64 MiB VMEM (and default
    # scoped limits).  ViT-B/32 bf16: ~0.7 MB/tensor -> ~2.9 MB double-buffered: fine.
    # ViT-L/14-scale backbones (T=257, L=24, H=16) do NOT fit — switch to
    # grid=(batch, layer) with the layer axis 'arbitrary' and R in VMEM scratch.
    elt = jnp.dtype(attn_probs.dtype).itemsize
    block_bytes = 2 * num_layers * heads * t * t * elt       # both tensors, one batch
    assert 2 * block_bytes < (48 << 20), (
        "per-batch rollout block too large for VMEM; use the per-layer grid form")

    # Host-built separable bilinear matrices indexed directly by token id, so the
    # kernel never reshapes (49,) -> (7,7):
    #   A[o, t] = W[o, (t-1)//7],  B[p, t] = W[p, (t-1)%7]   for t >= 1, else 0.
    w7 = _bilinear_matrix(CLIP_INPUT, GRID)                                 # (224, 7)
    patch = np.arange(1, t) - 1
    a = np.zeros((CLIP_INPUT, t), dtype=np.float32)
    b = np.zeros((CLIP_INPUT, t), dtype=np.float32)
    a[:, 1:] = w7[:, patch // GRID]
    b[:, 1:] = w7[:, patch % GRID]

    return pl.pallas_call(
        functools.partial(_rollout_relevance_kernel, start=start),
        out_shape=jax.ShapeDtypeStruct((batch, CLIP_INPUT, CLIP_INPUT), jnp.float32),
        grid=(batch,),
        in_specs=[
            pl.BlockSpec((num_layers, None, heads, t, t), lambda bb: (0, bb, 0, 0, 0)),
            pl.BlockSpec((num_layers, None, heads, t, t), lambda bb: (0, bb, 0, 0, 0)),
            pl.BlockSpec((CLIP_INPUT, t), lambda bb: (0, 0)),
            pl.BlockSpec((CLIP_INPUT, t), lambda bb: (0, 0)),
        ],
        out_specs=pl.BlockSpec((None, CLIP_INPUT, CLIP_INPUT), lambda bb: (bb, 0, 0)),
        compiler_params=pltpu.CompilerParams(
            dimension_semantics=("parallel",),
            # ~5 MB actually needed for ViT-B/32 bf16; 32 MiB documents headroom and
            # stays within every generation's physical VMEM.
            vmem_limit_bytes=32 * 1024 * 1024,
        ),
    )(attn_probs, attn_grads, jnp.asarray(a), jnp.asarray(b))


# ------------------------------------------------------------------------------- forward
def clip_relevancy_forward(img, attn_probs, attn_grads, relevancy_num_layers,
                           do_preprocess=True):
    if do_preprocess:
        img = preprocess(img)  # feeds CLIP's visual tower in the original model
    # TODO(synk): CLIP ViT-B/32 forward + torch.autograd.grad (which produce
    # attn_probs / attn_grads from `img` and the tokenized text) have no clean
    # Pallas equivalent here; they are provided as (bf16) inputs instead.
    return rollout_relevance(attn_probs, attn_grads, relevancy_num_layers)  # (B,224,224)


# ----------------------------------------------------------------------------- reference
def _reference(attn_probs, attn_grads, relevancy_num_layers):
    hp = jax.lax.Precision.HIGHEST
    ap = attn_probs.astype(jnp.float32)
    ag = attn_grads.astype(jnp.float32)
    num_layers, batch, _, t, _ = ap.shape
    r = jnp.tile(jnp.eye(t, dtype=jnp.float32)[None], (batch, 1, 1))
    for i in range(num_layers):
        if i <= relevancy_num_layers:
            continue
        cam = jnp.maximum(ag[i] * ap[i], 0.0).mean(axis=1)
        r = r + jnp.einsum("bij,bjk->bik", cam, r, precision=hp)
    rel = r[:, 0, 1:].reshape(batch, GRID, GRID)
    w = jnp.asarray(_bilinear_matrix(CLIP_INPUT, GRID))
    up = jnp.einsum("oi,bij,pj->bop", w, rel, w, precision=hp)
    mn = up.min(axis=(1, 2), keepdims=True)
    mx = up.max(axis=(1, 2), keepdims=True)
    return (up - mn) / (mx - mn)


def _reference_preprocess(img):
    hp = jax.lax.Precision.HIGHEST
    n, c, hin, win = img.shape
    ry = jnp.asarray(_bilinear_matrix(CLIP_INPUT, hin))
    rx = jnp.asarray(_bilinear_matrix(CLIP_INPUT, win))
    up = jnp.einsum("oh,nchw,pw->ncop", ry, img, rx, precision=hp)
    mean = jnp.asarray(CLIP_MEAN, dtype=jnp.float32).reshape(1, c, 1, 1)
    std = jnp.asarray(CLIP_STD, dtype=jnp.float32).reshape(1, c, 1, 1)
    return (up - mean) / std


if __name__ == "__main__":
    key = jax.random.PRNGKey(0)
    N, C, HIN, WIN = 1, 3, 16, 16      # input image (NCHW)
    B = 2                              # number of text prompts (CLIP text batch)
    L = 4                              # synthetic transformer depth (real ViT-B/32: 12)
    HEADS = 4                          # synthetic head count (real: 12)
    T = GRID * GRID + 1                # 50 tokens = CLS + 7*7 patches
    RELEVANCY_NUM_LAYERS = 1

    k1, k2, k3 = jax.random.split(key, 3)
    img = jax.random.uniform(k1, (N, C, HIN, WIN), dtype=jnp.float32)
    attn_logits = jax.random.normal(k2, (L, B, HEADS, T, T), dtype=jnp.float32)
    # Producer-side bf16 transport (halves the HBM read of the bandwidth-bound rollout).
    attn_probs = jax.nn.softmax(attn_logits, axis=-1).astype(jnp.bfloat16)
    attn_grads = jax.random.normal(k3, (L, B, HEADS, T, T), dtype=jnp.float32).astype(jnp.bfloat16)

    out = clip_relevancy_forward(img, attn_probs, attn_grads, RELEVANCY_NUM_LAYERS)
    out = jax.block_until_ready(out)
    assert out.shape == (B, CLIP_INPUT, CLIP_INPUT) and out.dtype == jnp.float32

    ref = jax.block_until_ready(_reference(attn_probs, attn_grads, RELEVANCY_NUM_LAYERS))
    np.testing.assert_allclose(np.asarray(out), np.asarray(ref), rtol=1e-2, atol=1e-2)

    pre = jax.block_until_ready(preprocess(img))
    pre_ref = jax.block_until_ready(_reference_preprocess(img))
    np.testing.assert_allclose(np.asarray(pre), np.asarray(pre_ref), rtol=1e-2, atol=1e-2)

    print("KERNEL_OK")
</pallas_src>

<mosaic_0001>
module attributes {stable_mosaic.version = 11 : i64} {
  func.func @_preprocess_kernel(%arg0: i32, %arg1: i32, %arg2: memref<1x1x16x16xf32, #tpu.memory_space<vmem>>, %arg3: memref<224x16xf32, #tpu.memory_space<vmem>>, %arg4: memref<1x16x224xf32, #tpu.memory_space<vmem>>, %arg5: memref<3xf32, #tpu.memory_space<smem>>, %arg6: memref<1x1x224x224xf32, #tpu.memory_space<vmem>>) attributes {dimension_semantics = [#tpu.dimension_semantics<parallel>, #tpu.dimension_semantics<parallel>], iteration_bounds = array<i64: 1, 3>, scalar_prefetch = 0 : i64, scratch_operands = 0 : i64, tpu.core_type = #tpu.core_type<tc>, window_params = [{transform_indices = @transform_0, window_bounds = array<i64: 1, 1, 16, 16>}, {pipeline_mode = #tpu.pipeline_mode<synchronous>, transform_indices = @transform_1, window_bounds = array<i64: 224, 16>}, {transform_indices = @transform_2, window_bounds = array<i64: 1, 16, 224>}, {transform_indices = @transform_3, window_bounds = array<i64: 3>}, {transform_indices = @transform_4, window_bounds = array<i64: 1, 1, 224, 224>}]} {
    %c0 = arith.constant 0 : index
    %c0_0 = arith.constant 0 : index
    %0 = vector.load %arg3[%c0, %c0_0] : memref<224x16xf32, #tpu.memory_space<vmem>>, vector<224x16xf32>
    %c0_1 = arith.constant 0 : index
    %c0_2 = arith.constant 0 : index
    %c0_3 = arith.constant 0 : index
    %c0_4 = arith.constant 0 : index
    %1 = vector.load %arg2[%c0_1, %c0_2, %c0_3, %c0_4] : memref<1x1x16x16xf32, #tpu.memory_space<vmem>>, vector<1x1x16x16xf32>
    %2 = vector.shape_cast %1 : vector<1x1x16x16xf32> to vector<16x16xf32>
    %cst = arith.constant dense<0.000000e+00> : vector<224x16xf32>
    %3 = tpu.matmul %0, %2, %cst {dimension_numbers = #tpu.dot_dimension_numbers<[1], [0], [0], [1], [0, 0, 1, 1], [], []>} : vector<224x16xf32>, vector<16x16xf32>, vector<224x16xf32> -> vector<224x16xf32>
    %c0_5 = arith.constant 0 : index
    %c0_6 = arith.constant 0 : index
    %c0_7 = arith.constant 0 : index
    %4 = vector.load %arg4[%c0_5, %c0_6, %c0_7] : memref<1x16x224xf32, #tpu.memory_space<vmem>>, vector<1x16x224xf32>
    %5 = vector.shape_cast %4 : vector<1x16x224xf32> to vector<16x224xf32>
    %cst_8 = arith.constant dense<0.000000e+00> : vector<224x224xf32>
    %6 = tpu.matmul %3, %5, %cst_8 {dimension_numbers = #tpu.dot_dimension_numbers<[1], [0], [0], [1], [0, 0, 1, 1], [], []>} : vector<224x16xf32>, vector<16x224xf32>, vector<224x224xf32> -> vector<224x224xf32>
    %7 = arith.index_cast %arg1 : i32 to index
    %8 = memref.load %arg5[%7] : memref<3xf32, #tpu.memory_space<smem>>
    %9 = vector.broadcast %8 : f32 to vector<224x224xf32>
    %10 = arith.addf %6, %9 : vector<224x224xf32>
    %c0_9 = arith.constant 0 : index
    %c0_10 = arith.constant 0 : index
    %c0_11 = arith.constant 0 : index
    %c0_12 = arith.constant 0 : index
    %11 = vector.load %arg6[%c0_9, %c0_10, %c0_11, %c0_12] : memref<1x1x224x224xf32, #tpu.memory_space<vmem>>, vector<1x1x224x224xf32>
    %12 = vector.shape_cast %11 : vector<1x1x224x224xf32> to vector<224x224xf32>
    %13 = vector.shape_cast %10 : vector<224x224xf32> to vector<1x1x224x224xf32>
    tpu.vector_store %arg6[%c0_9, %c0_10, %c0_11, %c0_12], %13 {strides = array<i32>} : memref<1x1x224x224xf32, #tpu.memory_space<vmem>>, vector<1x1x224x224xf32>,
    return
  }
  func.func @transform_0(%arg0: i32, %arg1: i32) -> (i32, i32, i32, i32) {
    %c0_i32 = arith.constant 0 : i32
    %c0_i32_0 = arith.constant 0 : i32
    %c0_i32_1 = arith.constant 0 : i32
    return %arg0, %arg1, %c0_i32, %c0_i32_0 : i32, i32, i32, i32
  }
  func.func @transform_1(%arg0: i32, %arg1: i32) -> (i32, i32) {
    %c0_i32 = arith.constant 0 : i32
    %c0_i32_0 = arith.constant 0 : i32
    %c0_i32_1 = arith.constant 0 : i32
    return %c0_i32, %c0_i32_0 : i32, i32
  }
  func.func @transform_2(%arg0: i32, %arg1: i32) -> (i32, i32, i32) {
    %c0_i32 = arith.constant 0 : i32
    %c0_i32_0 = arith.constant 0 : i32
    %c0_i32_1 = arith.constant 0 : i32
    return %arg1, %c0_i32, %c0_i32_0 : i32, i32, i32
  }
  func.func @transform_3(%arg0: i32, %arg1: i32) -> i32 {
    %c0_i32 = arith.constant 0 : i32
    %c0_i32_0 = arith.constant 0 : i32
    return %c0_i32 : i32
  }
  func.func @transform_4(%arg0: i32, %arg1: i32) -> (i32, i32, i32, i32) {
    %c0_i32 = arith.constant 0 : i32
    %c0_i32_0 = arith.constant 0 : i32
    %c0_i32_1 = arith.constant 0 : i32
    return %arg0, %arg1, %c0_i32, %c0_i32_0 : i32, i32, i32, i32
  }
}

</mosaic_0001>

<bundles_post_ra>
// kernel: tpu_custom_call.1
= control target key start
LH: loop header
LB: loop body
LE: loop exit
PB: predicated region body
PF: predicated region fallthrough
CT: control target
= control target key end

     0   :  { %9 = vsyncpa [#allocation4], 0  ;;  %s1895_s0 = inlined_call_operand.vmem [shape: f32[1,3,16,16], index: 0, kind: input, shape index: {}]   ;;  %s1896_s1 = inlined_call_operand.vmem [shape: f32[224,16], index: 1, kind: input, shape index: {}]   ;;  %s1897_s2 = inlined_call_operand.vmem [shape: f32[3,16,224], index: 2, kind: input, shape index: {}]   ;;  %s1898_s3 = inlined_call_operand.vmem [shape: f32[3], index: 3, kind: input, shape index: {}]   ;;  %s1899_s4 = inlined_call_operand.hbm [shape: f32[1,3,224,224], index: 4, kind: output, shape index: {}]  }
   0x1   :  { %10 = vsyncpa [#allocation3], 0 }
   0x2   :  { %12 = vsyncpa [#allocation3 + $0x1], 0  ;;  %s1438_s15 = smov 0   ;;  %s1440_s16 = smov 0  }
   0x3   :  { %s1442_s17 = smov 0   ;;  %s1444_s18 = smov 0  }
   0x4   :  { %s1446_s19 = smov 0   ;;  %s1448_s20 = smov 0  }
   0x5 LB: > { %s1080_s21 = sadd.s32 4294967295, %s1406_s20   ;;  %s1081_s22 = sadd.s32 4294967294, %s1406_s20   ;;  %s1406_s20 = sphi %s1448_s20, %s18_s20   ;;  %s1402_s19 = sphi %s1446_s19, %s1908_s19   ;;  %s1398_s18 = sphi %s1444_s18, %s1907_s18   ;;  %s1394_s17 = sphi %s1442_s17, %s1906_s17   ;;  %s1390_s16 = sphi %s1440_s16, %s1905_s16   ;;  %s1386_s15 = sphi %s1438_s15, %s1904_s15  }
   0x6   : > { %s27_s23 = sadd.s32 1, %s1402_s19  ;;  %s135_s24 = sadd.s32 1, %s1394_s17 }
   0x7   : > { %p28_p0 = scmp.ge.s32.totalorder %s27_s23, 3  ;;  %p145_p1 = scmp.ne.s32.totalorder %s1394_s17, %s1390_s16 }
   0x8   : > { %p146_p2 = scmp.eq.s32.totalorder %s1080_s21, 2  ;;  %p151_p3 = scmp.ne.s32.totalorder %s1390_s16, %s1386_s15 }
   0x9   : > { %s1910_s23 = smov (%p28_p0, %s27_s23), 0  ;;  %p152_p5 = scmp.eq.s32.totalorder %s1081_s22, 2 }
   0xa   : > { %p1478_p4 = por %p146_p2, %p145_p1  ;;  %s131_s26 = ssub.s32 %s1402_s19, %s1910_s23 }
   0xb   : > { %p1082_p6 = scmp.ge.s32.totalorder %s1406_s20, 1  ;;  %p133_p7 = scmp.eq.s32.totalorder %s131_s26, 0 }
   0xc   : > { %p1485_p8 = por %p152_p5, %p151_p3  ;;  %p159_p9 = scmp.lt.s32.totalorder %s1406_s20, 4 }
   0xd   : > { %s1491_s28 = scalar_select %p133_p7, %s1394_s17, %s135_s24  }
   0xe   : > { %p1493_p10 = pnand %p1082_p6, %p159_p9  ;;  %p1497_p11 = scmp.eq.s32.totalorder %s1080_s21, 0 }
   0xf   : > { %s175_s7 = sshll.u32 %s1898_s3, 4  ;;  %s176_s7 = int_to_ptr.vmem [resolvable:$true] %s175_s7 }
  0x10   : > { %p1246_p12 = pneg %p1493_p10  ;;  %s1309_s8 = scalar_lea.vmem %s176_s7, 16 }
  0x11   : > { %p1310_p0 = scmp.ne.s32.totalorder %s176_s7, %s1309_s8  ;;  %p1317_p5 = scmp.lt.s32.totalorder %s176_s7, %s176_s7 }
  0x12   : > { %p1247_p13 = pnand %p1497_p11, %p1246_p12  ;;  %p1318_p6 = scmp.lt.s32.totalorder %s1309_s8, %s1309_s8 }
  0x14   : > { %p1311_p1 = pneg %p1247_p13  ;;  %p1319_p7 = por %p1318_p6, %p1317_p5 }
  0x16   : > { %p1312_p2 = pnand %p1311_p1, %p1310_p0 }
  0x18   : > { %p1313_p3 = pneg %p1312_p2 }
  0x1a   : > { %p1320_p9 = pnand %p1319_p7, %p1313_p3 }
  0x1c   : > { %1323 = shalt.err (!%p1320_p9)
}
  0x1d   : > { %s1408_s9 = smov [#allocation2]   ;;  %208 = sbr.rel (%p1493_p10) target bundleno = 587 (0x24b), region = 36 }
  0x1e   : > { %1249 = dma.vmem_to_smem (!%p1247_p13), %s176_s7, 16, %s1408_s9, [#allocation4]  }
  0x24   : > { %1377 = dma.done.wait (%p1497_p11), [#allocation4], 16  }
  0x25   : > { %1379 = vsyncadd (%p1497_p11), [#allocation4], 4294967280 }
  0x26   : > { %214 = sfence }
  0x27   : > { %p246_p12 = scmp.lt.s32.totalorder %s1398_s18, 2  ;;  %v258_v0 = vld [vmem:[%s1896_s1] sm:$0xff]  ;;  %vm288_vm0 = vcmask 130048   ;;  %v259_v4 = vld [vmem:[%s1896_s1 + $0x8] sm:$0xff]  ;;  %v260_v8 = vld [vmem:[%s1896_s1 + $0x10] sm:$0xff]  ;;  %v1409_v37 = vmov 0.0  }
  0x28   : > { %1186 = vmatprep.mubr.msk.f32.mxu0 %vm288_vm0, %v258_v0  ;;  %v261_v12 = vld [vmem:[%s1896_s1 + $0x18] sm:$0xff]  ;;  %v262_v13 = vld [vmem:[%s1896_s1 + $0x20] sm:$0xff]  ;;  %v263_v14 = vld [vmem:[%s1896_s1 + $0x28] sm:$0xff]  ;;  %774 = vmatprep.mubr.f32.mxu1 %v1409_v37  ;;  %s582_s11 = sld [smem:[#allocation2 + %s1398_s18]]  ;;  %vm902_vm1 = vcmask 785408   ;;  %s1239_s21 = smul.u32 7168, %s1398_s18 }
  0x29   : > { %s247_s12 = scalar_select %p246_p12, %s1398_s18, 2  ;;  %v264_v15 = vld [vmem:[%s1896_s1 + $0x30] sm:$0xff]  ;;  %v265_v16 = vld [vmem:[%s1896_s1 + $0x38] sm:$0xff]  ;;  %v266_v17 = vld [vmem:[%s1896_s1 + $0x40] sm:$0xff] }
  0x2a   : > { %v267_v18 = vld [vmem:[%s1896_s1 + $0x48] sm:$0xff]  ;;  %v268_v19 = vld [vmem:[%s1896_s1 + $0x50] sm:$0xff]  ;;  %v269_v20 = vld [vmem:[%s1896_s1 + $0x58] sm:$0xff]  ;;  %s1839_s29 = scalar_lea.hbm %s1899_s4, %s1239_s21  ;;  %s1410_s5 = smov [#allocation5]  }
  0x2b   : > { %s1150_s13 = sshll.u32 %s247_s12, 4  ;;  %s1151_s14 = sshll.u32 %s247_s12, 5  ;;  %v270_v21 = vld [vmem:[%s1896_s1 + $0x60] sm:$0xff]  ;;  %v271_v22 = vld [vmem:[%s1896_s1 + $0x68] sm:$0xff]  ;;  %v272_v23 = vld [vmem:[%s1896_s1 + $0x70] sm:$0xff] }
  0x2c   : > { %s252_s24 = scalar_lea.vmem %s1895_s0, %s1150_s13  ;;  %s257_s30 = scalar_lea.vmem %s1897_s2, %s1151_s14  ;;  %v273_v24 = vld [vmem:[%s1896_s1 + $0x78] sm:$0xff]  ;;  %v274_v25 = vld [vmem:[%s1896_s1 + $0x80] sm:$0xff]  ;;  %v275_v26 = vld [vmem:[%s1896_s1 + $0x88] sm:$0xff] }
  0x2d   : > { %v286_v1 = vld [vmem:[%s252_s24] sm:$0xff]  ;;  %v287_v2 = vld [vmem:[%s252_s24 + $0x8] sm:$0xff]  ;;  %v581_v6 = vld [vmem:[%s257_s30 + $0x18] sm:$0xff]  ;;  %s241_s12 = sand.u32 1, %s1390_s16   ;;  %s1328_s6 = sshll.u32 %s1410_s5, 4  ;;  %s1329_s6 = int_to_ptr.vmem [resolvable:$false] %s1328_s6 }
  0x2e   : > { %v1228_v3 = vpack.c.bf16 %v287_v2, %v286_v1  ;;  %v579_v5 = vld [vmem:[%s257_s30 + $0x8] sm:$0xff]  ;;  %v578_v7 = vld [vmem:[%s257_s30] sm:$0xff]  ;;  %v580_v10 = vld [vmem:[%s257_s30 + $0x10] sm:$0xff]  ;;  %s1238_s13 = smul.u32 448, %s241_s12  ;;  %v1694_v2 = vstv %s582_s11  ;;  %s1849_s18 = scalar_lea.sflag [#allocation3], %s241_s12 }
  0x2f   : > { %v1232_v9 = vpack.c.bf16 %v581_v6, %v579_v5  ;;  %v1234_v11 = vpack.c.bf16 %v580_v10, %v578_v7  ;;  %v276_v27 = vld [vmem:[%s1896_s1 + $0x90] sm:$0xff]  ;;  %v277_v28 = vld [vmem:[%s1896_s1 + $0x98] sm:$0xff]  ;;  %v278_v29 = vld [vmem:[%s1896_s1 + $0xa0] sm:$0xff]  ;;  %s1330_s7 = scalar_lea.vmem %s1329_s6, 14336 }
  0x30   : > { %1229 = vmatprep.subr.bf16.mxu0 %v1228_v3  ;;  %v279_v30 = vld [vmem:[%s1896_s1 + $0xa8] sm:$0xff]  ;;  %v280_v31 = vld [vmem:[%s1896_s1 + $0xb0] sm:$0xff]  ;;  %v281_v32 = vld [vmem:[%s1896_s1 + $0xb8] sm:$0xff]  ;;  %s1698_s14 = scalar_lea.vmem [#allocation5], %s1238_s13 }
  0x31   : > { %1231 = vmatpush3.bf16.msra.mxu0 %v1228_v3  ;;  %1236 = vmatprep.subr.bf16.mxu1 %v1232_v9  ;;  %v282_v33 = vld [vmem:[%s1896_s1 + $0xc0] sm:$0xff]  ;;  %v283_v34 = vld [vmem:[%s1896_s1 + $0xc8] sm:$0xff]  ;;  %v284_v35 = vld [vmem:[%s1896_s1 + $0xd0] sm:$0xff]  ;;  %s974_s22 = sshll.u32 %s1698_s14, 4  ;;  %s1841_s22 = int_to_ptr.vmem [resolvable:$true] %s974_s22 }
  0x32   : > { %1233 = vmatprep.subr.bf16.mxu0 %v1232_v9  ;;  %1237 = vmatpush1.bf16.msra.mxu1 %v1234_v11  ;;  %v285_v36 = vld [vmem:[%s1896_s1 + $0xd8] sm:$0xff]  ;;  %s1324_s30 = scalar_lea.vmem %s1841_s22, 7168  ;;  %p1331_p0 = scmp.lt.s32.totalorder %s1841_s22, %s1329_s6 }
  0x33   : > { %p1325_p10 = scmp.ne.s32.totalorder %s1841_s22, %s1324_s30  ;;  %p1332_p1 = scmp.lt.s32.totalorder %s1330_s7, %s1324_s30 }
  0x34   : > { %1187 = vmatmul.mubr.msk.f32.vlgmr.msra.gmra.mrb[0].mxu0 %vm288_vm0, %v259_v4 }
  0x35   : > { %1189 = vmatprep.mubr.msk.f32.mxu0 %vm288_vm0, %v260_v8  ;;  %1235 = vmatpush1.bf16.msra.mxu0 %v1234_v11  ;;  %p1326_p11 = pnand %p1325_p10, %p1478_p4  ;;  %p1333_p2 = por %p1332_p1, %p1331_p0 }
  0x37   : > { %p1327_p13 = pneg %p1326_p11 }
  0x38   : > { %1190 = vmatmul.mubr.msk.f32.gmra.mrb[2].mxu0 %vm288_vm0, %v261_v12 }
  0x39   : > { %1192 = vmatprep.mubr.msk.f32.mxu0 %vm288_vm0, %v262_v13  ;;  %p1334_p3 = pnand %p1333_p2, %p1327_p13 }
  0x3c   : > { %1193 = vmatmul.mubr.msk.f32.gmra.mrb[4].mxu0 %vm288_vm0, %v263_v14 }
  0x3d   : > { %1195 = vmatprep.mubr.msk.f32.mxu0 %vm288_vm0, %v264_v15 }
  0x40   : > { %1196 = vmatmul.mubr.msk.f32.gmra.mrb[6].mxu0 %vm288_vm0, %v265_v16 }
  0x41   : > { %1198 = vmatprep.mubr.msk.f32.mxu0 %vm288_vm0, %v266_v17 }
  0x44   : > { %1199 = vmatmul.mubr.msk.f32.gmra.mrb[8].mxu0 %vm288_vm0, %v267_v18 }
  0x45   : > { %1201 = vmatprep.mubr.msk.f32.mxu0 %vm288_vm0, %v268_v19 }
  0x48   : > { %1202 = vmatmul.mubr.msk.f32.gmra.mrb[10].mxu0 %vm288_vm0, %v269_v20 }
  0x49   : > { %1204 = vmatprep.mubr.msk.f32.mxu0 %vm288_vm0, %v270_v21 }
  0x4c   : > { %1205 = vmatmul.mubr.msk.f32.gmra.mrb[12].mxu0 %vm288_vm0, %v271_v22 }
  0x4d   : > { %1207 = vmatprep.mubr.msk.f32.mxu0 %vm288_vm0, %v272_v23 }
  0x50   : > { %1208 = vmatmul.mubr.msk.f32.gmra.mrb[14].mxu0 %vm288_vm0, %v273_v24 }
  0x51   : > { %1210 = vmatprep.mubr.msk.f32.mxu0 %vm288_vm0, %v274_v25 }
  0x54   : > { %1211 = vmatmul.mubr.msk.f32.gmra.mrb[16].mxu0 %vm288_vm0, %v275_v26 }
  0x55   : > { %1213 = vmatprep.mubr.msk.f32.mxu0 %vm288_vm0, %v276_v27 }
  0x58   : > { %1214 = vmatmul.mubr.msk.f32.gmra.mrb[18].mxu0 %vm288_vm0, %v277_v28 }
  0x59   : > { %1216 = vmatprep.mubr.msk.f32.mxu0 %vm288_vm0, %v278_v29 }
  0x5c   : > { %1217 = vmatmul.mubr.msk.f32.gmra.mrb[20].mxu0 %vm288_vm0, %v279_v30 }
  0x5d   : > { %1219 = vmatprep.mubr.msk.f32.mxu0 %vm288_vm0, %v280_v31 }
  0x60   : > { %1220 = vmatmul.mubr.msk.f32.gmra.mrb[22].mxu0 %vm288_vm0, %v281_v32 }
  0x61   : > { %1222 = vmatprep.mubr.msk.f32.mxu0 %vm288_vm0, %v282_v33 }
  0x64   : > { %1223 = vmatmul.mubr.msk.f32.gmra.mrb[24].mxu0 %vm288_vm0, %v283_v34 }
  0x65   : > { %1225 = vmatprep.mubr.msk.f32.mxu0 %vm288_vm0, %v284_v35 }
  0x68   : > { %1226 = vmatmul.mubr.msk.f32.gmra.mrb[26].mxu0 %vm288_vm0, %v285_v36 }
  0x69   : > { %732 = vmatprep.mubr.f32.mxu0 %v1409_v37 }
 0x107   : > { %v1188_v38 = vpop.f32.mrb[0].mxu0 }
 0x108   : > { %v439_v39 = vpop.f32.mrb[1].mxu0 }
 0x109   : > { %1119 = vmatmul.mubr.msk.f32.vlgmr.msra.gmra.mrb[28].mxu0 %vm288_vm0, %v439_v39 }
 0x10a   : > { %738 = vmatprep.mubr.f32.mxu0 %v1409_v37 }
 0x10b   : > { %v1191_v40 = vpop.f32.mrb[2].mxu0 }
 0x10c   : > { %v449_v41 = vpop.f32.mrb[3].mxu0 }
 0x10d   : > { %1120 = vmatmul.mubr.msk.f32.gmra.mrb[30].mxu0 %vm288_vm0, %v1188_v38 }
 0x10e   : > { %744 = vmatprep.mubr.f32.mxu0 %v1409_v37 }
 0x10f   : > { %v1194_v42 = vpop.f32.mrb[4].mxu0 }
 0x110   : > { %v459_v43 = vpop.f32.mrb[5].mxu0 }
 0x111   : > { %1121 = vmatmul.mubr.msk.f32.gmra.mrb[32].mxu0 %vm288_vm0, %v449_v41 }
 0x112   : > { %750 = vmatprep.mubr.f32.mxu0 %v1409_v37 }
 0x113   : > { %v1197_v44 = vpop.f32.mrb[6].mxu0 }
 0x114   : > { %v469_v45 = vpop.f32.mrb[7].mxu0  ;;  %1126 = vmatmul.mubr.msk.f32.vlgmr.msra.gmra.mrb[0].mxu1 %vm288_vm0, %v1197_v44 }
 0x115   : > { %1122 = vmatmul.mubr.msk.f32.gmra.mrb[34].mxu0 %vm288_vm0, %v1191_v40  ;;  %780 = vmatprep.mubr.f32.mxu1 %v1409_v37 }
 0x116   : > { %756 = vmatprep.mubr.f32.mxu0 %v1409_v37 }
 0x117   : > { %v1200_v46 = vpop.f32.mrb[8].mxu0 }
 0x118   : > { %v479_v47 = vpop.f32.mrb[9].mxu0 }
 0x119   : > { %1123 = vmatmul.mubr.msk.f32.gmra.mrb[36].mxu0 %vm288_vm0, %v459_v43  ;;  %1127 = vmatmul.mubr.msk.f32.gmra.mrb[2].mxu1 %vm288_vm0, %v479_v47 }
 0x11a   : > { %762 = vmatprep.mubr.f32.mxu0 %v1409_v37  ;;  %786 = vmatprep.mubr.f32.mxu1 %v1409_v37 }
 0x11b   : > { %v1203_v48 = vpop.f32.mrb[10].mxu0 }
 0x11c   : > { %v489_v49 = vpop.f32.mrb[11].mxu0 }
 0x11d   : > { %1124 = vmatmul.mubr.msk.f32.gmra.mrb[38].mxu0 %vm288_vm0, %v1194_v42  ;;  %1128 = vmatmul.mubr.msk.f32.gmra.mrb[4].mxu1 %vm288_vm0, %v1200_v46 }
 0x11e   : > { %768 = vmatprep.mubr.f32.mxu0 %v1409_v37  ;;  %792 = vmatprep.mubr.f32.mxu1 %v1409_v37 }
 0x11f   : > { %v1206_v50 = vpop.f32.mrb[12].mxu0 }
 0x120   : > { %v499_v51 = vpop.f32.mrb[13].mxu0 }
 0x121   : > { %1125 = vmatmul.mubr.msk.f32.gmra.mrb[40].mxu0 %vm288_vm0, %v469_v45  ;;  %1129 = vmatmul.mubr.msk.f32.gmra.mrb[6].mxu1 %vm288_vm0, %v489_v49 }
 0x122   : > { %798 = vmatprep.mubr.f32.mxu1 %v1409_v37 }
 0x123   : > { %v1209_v52 = vpop.f32.mrb[14].mxu0 }
 0x124   : > { %v509_v53 = vpop.f32.mrb[15].mxu0 }
 0x125   : > { %1130 = vmatmul.mubr.msk.f32.gmra.mrb[8].mxu1 %vm288_vm0, %v1203_v48 }
 0x126   : > { %804 = vmatprep.mubr.f32.mxu1 %v1409_v37 }
 0x127   : > { %v1212_v54 = vpop.f32.mrb[16].mxu0 }
 0x128   : > { %v519_v55 = vpop.f32.mrb[17].mxu0 }
 0x129   : > { %1131 = vmatmul.mubr.msk.f32.gmra.mrb[10].mxu1 %vm288_vm0, %v499_v51 }
 0x12a   : > { %810 = vmatprep.mubr.f32.mxu1 %v1409_v37 }
 0x12b   : > { %v1215_v56 = vpop.f32.mrb[18].mxu0 }
 0x12c   : > { %v529_v57 = vpop.f32.mrb[19].mxu0 }
 0x12d   : > { %1132 = vmatmul.mubr.msk.f32.gmra.mrb[12].mxu1 %vm288_vm0, %v1206_v50 }
 0x12e   : > { %816 = vmatprep.mubr.f32.mxu1 %v1409_v37 }
 0x12f   : > { %v1218_v58 = vpop.f32.mrb[20].mxu0 }
 0x130   : > { %v539_v59 = vpop.f32.mrb[21].mxu0 }
 0x131   : > { %1133 = vmatmul.mubr.msk.f32.gmra.mrb[14].mxu1 %vm288_vm0, %v509_v53 }
 0x132   : > { %822 = vmatprep.mubr.f32.mxu1 %v1409_v37 }
 0x133   : > { %v1221_v60 = vpop.f32.mrb[22].mxu0 }
 0x134   : > { %v549_v61 = vpop.f32.mrb[23].mxu0 }
 0x135   : > { %1134 = vmatmul.mubr.msk.f32.gmra.mrb[16].mxu1 %vm288_vm0, %v1209_v52 }
 0x136   : > { %828 = vmatprep.mubr.f32.mxu1 %v1409_v37 }
 0x137   : > { %v1224_v62 = vpop.f32.mrb[24].mxu0 }
 0x138   : > { %v559_v63 = vpop.f32.mrb[25].mxu0 }
 0x139   : > { %1135 = vmatmul.mubr.msk.f32.gmra.mrb[18].mxu1 %vm288_vm0, %v519_v55 }
 0x13a   : > { %834 = vmatprep.mubr.f32.mxu1 %v1409_v37 }
 0x13b   : > { %v1227_v0 = vpop.f32.mrb[26].mxu0 }
 0x13c   : > { %v569_v1 = vpop.f32.mrb[27].mxu0 }
 0x13d   : > { %1136 = vmatmul.mubr.msk.f32.gmra.mrb[20].mxu1 %vm288_vm0, %v1212_v54 }
 0x13e   : > { %840 = vmatprep.mubr.f32.mxu1 %v1409_v37 }
 0x141   : > { %1137 = vmatmul.mubr.msk.f32.gmra.mrb[22].mxu1 %vm288_vm0, %v529_v57 }
 0x142   : > { %846 = vmatprep.mubr.f32.mxu1 %v1409_v37 }
 0x145   : > { %1138 = vmatmul.mubr.msk.f32.gmra.mrb[24].mxu1 %vm288_vm0, %v1215_v56 }
 0x146   : > { %852 = vmatprep.mubr.f32.mxu1 %v1409_v37 }
 0x149   : > { %1139 = vmatmul.mubr.msk.f32.gmra.mrb[26].mxu1 %vm288_vm0, %v539_v59 }
 0x14a   : > { %858 = vmatprep.mubr.f32.mxu1 %v1409_v37 }
 0x14d   : > { %1140 = vmatmul.mubr.msk.f32.gmra.mrb[28].mxu1 %vm288_vm0, %v1218_v58 }
 0x14e   : > { %864 = vmatprep.mubr.f32.mxu1 %v1409_v37 }
 0x151   : > { %1141 = vmatmul.mubr.msk.f32.gmra.mrb[30].mxu1 %vm288_vm0, %v549_v61 }
 0x152   : > { %870 = vmatprep.mubr.f32.mxu1 %v1409_v37 }
 0x155   : > { %1142 = vmatmul.mubr.msk.f32.gmra.mrb[32].mxu1 %vm288_vm0, %v1221_v60 }
 0x156   : > { %876 = vmatprep.mubr.f32.mxu1 %v1409_v37 }
 0x159   : > { %1143 = vmatmul.mubr.msk.f32.gmra.mrb[34].mxu1 %vm288_vm0, %v559_v63 }
 0x15a   : > { %882 = vmatprep.mubr.f32.mxu1 %v1409_v37 }
 0x15d   : > { %1144 = vmatmul.mubr.msk.f32.gmra.mrb[36].mxu1 %vm288_vm0, %v1224_v62 }
 0x15e   : > { %888 = vmatprep.mubr.f32.mxu1 %v1409_v37 }
 0x161   : > { %1145 = vmatmul.mubr.msk.f32.gmra.mrb[38].mxu1 %vm288_vm0, %v569_v1 }
 0x162   : > { %894 = vmatprep.mubr.f32.mxu1 %v1409_v37 }
 0x165   : > { %1146 = vmatmul.mubr.msk.f32.gmra.mrb[40].mxu1 %vm288_vm0, %v1227_v0 }
 0x1dc   : > { %v734_v3 = vpop.f32.mrb[28].mxu0 }
 0x1dd   : > { %v735_v4 = vadd.f32 %v734_v3, %v1694_v2  ;;  %v736_v5 = vpop.f32.mrb[29].mxu0 }
 0x1de   : > { %v737_v6 = vadd.f32 %v736_v5, %v1694_v2 }
 0x1df   : > { %901 = vst [vmem:[%s1698_s14] sm:$0xff] %v735_v4 }
 0x1e0   : > { %903 = vst.msk [vmem:[%s1698_s14 + $0x8] sm:$0xff] %vm902_vm1, %v737_v6  ;;  %v740_v7 = vpop.f32.mrb[30].mxu0 }
 0x1e1   : > { %v741_v8 = vadd.f32 %v740_v7, %v1694_v2  ;;  %v742_v9 = vpop.f32.mrb[31].mxu0 }
 0x1e2   : > { %v743_v10 = vadd.f32 %v742_v9, %v1694_v2 }
 0x1e3   : > { %904 = vst [vmem:[%s1698_s14 + $0x10] sm:$0xff] %v741_v8 }
 0x1e4   : > { %905 = vst.msk [vmem:[%s1698_s14 + $0x18] sm:$0xff] %vm902_vm1, %v743_v10  ;;  %v746_v11 = vpop.f32.mrb[32].mxu0 }
 0x1e5   : > { %v747_v12 = vadd.f32 %v746_v11, %v1694_v2  ;;  %v748_v13 = vpop.f32.mrb[33].mxu0 }
 0x1e6   : > { %v749_v14 = vadd.f32 %v748_v13, %v1694_v2 }
 0x1e7   : > { %906 = vst [vmem:[%s1698_s14 + $0x20] sm:$0xff] %v747_v12  ;;  %v776_v15 = vpop.f32.mrb[0].mxu1 }
 0x1e8   : > { %907 = vst.msk [vmem:[%s1698_s14 + $0x28] sm:$0xff] %vm902_vm1, %v749_v14  ;;  %v777_v16 = vadd.f32 %v776_v15, %v1694_v2  ;;  %v752_v17 = vpop.f32.mrb[34].mxu0  ;;  %v778_v18 = vpop.f32.mrb[1].mxu1 }
 0x1e9   : > { %v753_v19 = vadd.f32 %v752_v17, %v1694_v2  ;;  %v779_v20 = vadd.f32 %v778_v18, %v1694_v2  ;;  %v754_v21 = vpop.f32.mrb[35].mxu0 }
 0x1ea   : > { %916 = vst [vmem:[%s1698_s14 + $0x70] sm:$0xff] %v777_v16  ;;  %v755_v22 = vadd.f32 %v754_v21, %v1694_v2 }
 0x1eb   : > { %908 = vst [vmem:[%s1698_s14 + $0x30] sm:$0xff] %v753_v19  ;;  %917 = vst.msk [vmem:[%s1698_s14 + $0x78] sm:$0xff] %vm902_vm1, %v779_v20 }
 0x1ec   : > { %909 = vst.msk [vmem:[%s1698_s14 + $0x38] sm:$0xff] %vm902_vm1, %v755_v22  ;;  %v758_v23 = vpop.f32.mrb[36].mxu0  ;;  %v782_v24 = vpop.f32.mrb[2].mxu1 }
 0x1ed   : > { %v759_v25 = vadd.f32 %v758_v23, %v1694_v2  ;;  %v783_v26 = vadd.f32 %v782_v24, %v1694_v2  ;;  %v760_v27 = vpop.f32.mrb[37].mxu0  ;;  %v784_v28 = vpop.f32.mrb[3].mxu1 }
 0x1ee   : > { %v761_v29 = vadd.f32 %v760_v27, %v1694_v2  ;;  %v785_v30 = vadd.f32 %v784_v28, %v1694_v2 }
 0x1ef   : > { %910 = vst [vmem:[%s1698_s14 + $0x40] sm:$0xff] %v759_v25  ;;  %918 = vst [vmem:[%s1698_s14 + $0x80] sm:$0xff] %v783_v26 }
 0x1f0   : > { %911 = vst.msk [vmem:[%s1698_s14 + $0x48] sm:$0xff] %vm902_vm1, %v761_v29  ;;  %919 = vst.msk [vmem:[%s1698_s14 + $0x88] sm:$0xff] %vm902_vm1, %v785_v30  ;;  %v764_v31 = vpop.f32.mrb[38].mxu0  ;;  %v788_v32 = vpop.f32.mrb[4].mxu1 }
 0x1f1   : > { %v765_v33 = vadd.f32 %v764_v31, %v1694_v2  ;;  %v789_v34 = vadd.f32 %v788_v32, %v1694_v2  ;;  %v766_v35 = vpop.f32.mrb[39].mxu0  ;;  %v790_v36 = vpop.f32.mrb[5].mxu1 }
 0x1f2   : > { %v767_v37 = vadd.f32 %v766_v35, %v1694_v2  ;;  %v791_v38 = vadd.f32 %v790_v36, %v1694_v2 }
 0x1f3   : > { %912 = vst [vmem:[%s1698_s14 + $0x50] sm:$0xff] %v765_v33  ;;  %920 = vst [vmem:[%s1698_s14 + $0x90] sm:$0xff] %v789_v34 }
 0x1f4   : > { %913 = vst.msk [vmem:[%s1698_s14 + $0x58] sm:$0xff] %vm902_vm1, %v767_v37  ;;  %921 = vst.msk [vmem:[%s1698_s14 + $0x98] sm:$0xff] %vm902_vm1, %v791_v38  ;;  %v770_v39 = vpop.f32.mrb[40].mxu0  ;;  %v794_v40 = vpop.f32.mrb[6].mxu1 }
 0x1f5   : > { %v771_v41 = vadd.f32 %v770_v39, %v1694_v2  ;;  %v795_v42 = vadd.f32 %v794_v40, %v1694_v2  ;;  %v772_v43 = vpop.f32.mrb[41].mxu0  ;;  %v796_v44 = vpop.f32.mrb[7].mxu1 }
 0x1f6   : > { %v773_v45 = vadd.f32 %v772_v43, %v1694_v2  ;;  %v797_v46 = vadd.f32 %v796_v44, %v1694_v2 }
 0x1f7   : > { %914 = vst [vmem:[%s1698_s14 + $0x60] sm:$0xff] %v771_v41  ;;  %922 = vst [vmem:[%s1698_s14 + $0xa0] sm:$0xff] %v795_v42 }
 0x1f8   : > { %915 = vst.msk [vmem:[%s1698_s14 + $0x68] sm:$0xff] %vm902_vm1, %v773_v45  ;;  %923 = vst.msk [vmem:[%s1698_s14 + $0xa8] sm:$0xff] %vm902_vm1, %v797_v46  ;;  %v800_v47 = vpop.f32.mrb[8].mxu1 }
 0x1f9   : > { %v801_v48 = vadd.f32 %v800_v47, %v1694_v2  ;;  %v802_v49 = vpop.f32.mrb[9].mxu1 }
 0x1fa   : > { %v803_v50 = vadd.f32 %v802_v49, %v1694_v2 }
 0x1fb   : > { %924 = vst [vmem:[%s1698_s14 + $0xb0] sm:$0xff] %v801_v48 }
 0x1fc   : > { %925 = vst.msk [vmem:[%s1698_s14 + $0xb8] sm:$0xff] %vm902_vm1, %v803_v50  ;;  %v806_v51 = vpop.f32.mrb[10].mxu1 }
 0x1fd   : > { %v807_v52 = vadd.f32 %v806_v51, %v1694_v2  ;;  %v808_v53 = vpop.f32.mrb[11].mxu1 }
 0x1fe   : > { %v809_v54 = vadd.f32 %v808_v53, %v1694_v2 }
 0x1ff   : > { %926 = vst [vmem:[%s1698_s14 + $0xc0] sm:$0xff] %v807_v52 }
 0x200   : > { %927 = vst.msk [vmem:[%s1698_s14 + $0xc8] sm:$0xff] %vm902_vm1, %v809_v54  ;;  %v812_v55 = vpop.f32.mrb[12].mxu1 }
 0x201   : > { %v813_v56 = vadd.f32 %v812_v55, %v1694_v2  ;;  %v814_v57 = vpop.f32.mrb[13].mxu1 }
 0x202   : > { %v815_v58 = vadd.f32 %v814_v57, %v1694_v2 }
 0x203   : > { %928 = vst [vmem:[%s1698_s14 + $0xd0] sm:$0xff] %v813_v56 }
 0x204   : > { %929 = vst.msk [vmem:[%s1698_s14 + $0xd8] sm:$0xff] %vm902_vm1, %v815_v58  ;;  %v818_v59 = vpop.f32.mrb[14].mxu1 }
 0x205   : > { %v819_v60 = vadd.f32 %v818_v59, %v1694_v2  ;;  %v820_v61 = vpop.f32.mrb[15].mxu1 }
 0x206   : > { %v821_v62 = vadd.f32 %v820_v61, %v1694_v2 }
 0x207   : > { %930 = vst [vmem:[%s1698_s14 + $0xe0] sm:$0xff] %v819_v60 }
 0x208   : > { %931 = vst.msk [vmem:[%s1698_s14 + $0xe8] sm:$0xff] %vm902_vm1, %v821_v62  ;;  %v824_v63 = vpop.f32.mrb[16].mxu1 }
 0x209   : > { %v825_v0 = vadd.f32 %v824_v63, %v1694_v2  ;;  %v826_v1 = vpop.f32.mrb[17].mxu1 }
 0x20a   : > { %v827_v3 = vadd.f32 %v826_v1, %v1694_v2 }
 0x20b   : > { %932 = vst [vmem:[%s1698_s14 + $0xf0] sm:$0xff] %v825_v0 }
 0x20c   : > { %933 = vst.msk [vmem:[%s1698_s14 + $0xf8] sm:$0xff] %vm902_vm1, %v827_v3  ;;  %v830_v4 = vpop.f32.mrb[18].mxu1 }
 0x20d   : > { %v831_v5 = vadd.f32 %v830_v4, %v1694_v2  ;;  %v832_v6 = vpop.f32.mrb[19].mxu1 }
 0x20e   : > { %v833_v7 = vadd.f32 %v832_v6, %v1694_v2 }
 0x20f   : > { %934 = vst [vmem:[%s1698_s14 + $0x100] sm:$0xff] %v831_v5 }
 0x210   : > { %935 = vst.msk [vmem:[%s1698_s14 + $0x108] sm:$0xff] %vm902_vm1, %v833_v7  ;;  %v836_v8 = vpop.f32.mrb[20].mxu1 }
 0x211   : > { %v837_v9 = vadd.f32 %v836_v8, %v1694_v2  ;;  %v838_v10 = vpop.f32.mrb[21].mxu1 }
 0x212   : > { %v839_v11 = vadd.f32 %v838_v10, %v1694_v2 }
 0x213   : > { %936 = vst [vmem:[%s1698_s14 + $0x110] sm:$0xff] %v837_v9 }
 0x214   : > { %937 = vst.msk [vmem:[%s1698_s14 + $0x118] sm:$0xff] %vm902_vm1, %v839_v11  ;;  %v842_v12 = vpop.f32.mrb[22].mxu1 }
 0x215   : > { %v843_v13 = vadd.f32 %v842_v12, %v1694_v2  ;;  %v844_v14 = vpop.f32.mrb[23].mxu1 }
 0x216   : > { %v845_v15 = vadd.f32 %v844_v14, %v1694_v2 }
 0x217   : > { %938 = vst [vmem:[%s1698_s14 + $0x120] sm:$0xff] %v843_v13 }
 0x218   : > { %939 = vst.msk [vmem:[%s1698_s14 + $0x128] sm:$0xff] %vm902_vm1, %v845_v15  ;;  %v848_v16 = vpop.f32.mrb[24].mxu1 }
 0x219   : > { %v849_v17 = vadd.f32 %v848_v16, %v1694_v2  ;;  %v850_v18 = vpop.f32.mrb[25].mxu1 }
 0x21a   : > { %v851_v19 = vadd.f32 %v850_v18, %v1694_v2 }
 0x21b   : > { %940 = vst [vmem:[%s1698_s14 + $0x130] sm:$0xff] %v849_v17 }
 0x21c   : > { %941 = vst.msk [vmem:[%s1698_s14 + $0x138] sm:$0xff] %vm902_vm1, %v851_v19  ;;  %v854_v20 = vpop.f32.mrb[26].mxu1 }
 0x21d   : > { %v855_v21 = vadd.f32 %v854_v20, %v1694_v2  ;;  %v856_v22 = vpop.f32.mrb[27].mxu1 }
 0x21e   : > { %v857_v23 = vadd.f32 %v856_v22, %v1694_v2 }
 0x21f   : > { %942 = vst [vmem:[%s1698_s14 + $0x140] sm:$0xff] %v855_v21 }
 0x220   : > { %943 = vst.msk [vmem:[%s1698_s14 + $0x148] sm:$0xff] %vm902_vm1, %v857_v23  ;;  %v860_v24 = vpop.f32.mrb[28].mxu1 }
 0x221   : > { %v861_v25 = vadd.f32 %v860_v24, %v1694_v2  ;;  %v862_v26 = vpop.f32.mrb[29].mxu1 }
 0x222   : > { %v863_v27 = vadd.f32 %v862_v26, %v1694_v2 }
 0x223   : > { %944 = vst [vmem:[%s1698_s14 + $0x150] sm:$0xff] %v861_v25 }
 0x224   : > { %945 = vst.msk [vmem:[%s1698_s14 + $0x158] sm:$0xff] %vm902_vm1, %v863_v27  ;;  %v866_v28 = vpop.f32.mrb[30].mxu1 }
 0x225   : > { %v867_v29 = vadd.f32 %v866_v28, %v1694_v2  ;;  %v868_v30 = vpop.f32.mrb[31].mxu1 }
 0x226   : > { %v869_v31 = vadd.f32 %v868_v30, %v1694_v2 }
 0x227   : > { %946 = vst [vmem:[%s1698_s14 + $0x160] sm:$0xff] %v867_v29 }
 0x228   : > { %947 = vst.msk [vmem:[%s1698_s14 + $0x168] sm:$0xff] %vm902_vm1, %v869_v31  ;;  %v872_v32 = vpop.f32.mrb[32].mxu1 }
 0x229   : > { %v873_v33 = vadd.f32 %v872_v32, %v1694_v2  ;;  %v874_v34 = vpop.f32.mrb[33].mxu1 }
 0x22a   : > { %v875_v35 = vadd.f32 %v874_v34, %v1694_v2 }
 0x22b   : > { %948 = vst [vmem:[%s1698_s14 + $0x170] sm:$0xff] %v873_v33 }
 0x22c   : > { %949 = vst.msk [vmem:[%s1698_s14 + $0x178] sm:$0xff] %vm902_vm1, %v875_v35  ;;  %v878_v36 = vpop.f32.mrb[34].mxu1 }
 0x22d   : > { %v879_v37 = vadd.f32 %v878_v36, %v1694_v2  ;;  %v880_v38 = vpop.f32.mrb[35].mxu1 }
 0x22e   : > { %v881_v39 = vadd.f32 %v880_v38, %v1694_v2 }
 0x22f   : > { %950 = vst [vmem:[%s1698_s14 + $0x180] sm:$0xff] %v879_v37 }
 0x230   : > { %951 = vst.msk [vmem:[%s1698_s14 + $0x188] sm:$0xff] %vm902_vm1, %v881_v39  ;;  %v884_v40 = vpop.f32.mrb[36].mxu1 }
 0x231   : > { %v885_v41 = vadd.f32 %v884_v40, %v1694_v2  ;;  %v886_v42 = vpop.f32.mrb[37].mxu1 }
 0x232   : > { %v887_v43 = vadd.f32 %v886_v42, %v1694_v2 }
 0x233   : > { %952 = vst [vmem:[%s1698_s14 + $0x190] sm:$0xff] %v885_v41 }
 0x234   : > { %953 = vst.msk [vmem:[%s1698_s14 + $0x198] sm:$0xff] %vm902_vm1, %v887_v43  ;;  %v890_v44 = vpop.f32.mrb[38].mxu1 }
 0x235   : > { %v891_v45 = vadd.f32 %v890_v44, %v1694_v2  ;;  %v892_v46 = vpop.f32.mrb[39].mxu1 }
 0x236   : > { %v893_v47 = vadd.f32 %v892_v46, %v1694_v2 }
 0x237   : > { %954 = vst [vmem:[%s1698_s14 + $0x1a0] sm:$0xff] %v891_v45 }
 0x238   : > { %955 = vst.msk [vmem:[%s1698_s14 + $0x1a8] sm:$0xff] %vm902_vm1, %v893_v47  ;;  %v896_v48 = vpop.f32.mrb[40].mxu1 }
 0x239   : > { %v897_v49 = vadd.f32 %v896_v48, %v1694_v2  ;;  %v898_v50 = vpop.f32.mrb[41].mxu1 }
 0x23a   : > { %v899_v51 = vadd.f32 %v898_v50, %v1694_v2 }
 0x23b   : > { %956 = vst [vmem:[%s1698_s14 + $0x1b0] sm:$0xff] %v897_v49 }
 0x23c   : > { %957 = vst.msk [vmem:[%s1698_s14 + $0x1b8] sm:$0xff] %vm902_vm1, %v899_v51 }
 0x23d   : > { %1337 = shalt.err (!%p1334_p3)
}
 0x23e   : > { %s1338_s8 = scalar_lea.hbm %s1839_s29, 7168  ;;  %s1342_s11 = scalar_lea.hbm %s1899_s4, 21504 }
 0x23f   : > { %p1339_p5 = scmp.ne.s32.totalorder %s1839_s29, %s1338_s8  ;;  %p1343_p9 = scmp.lt.u32.totalorder %s1839_s29, %s1899_s4 }
 0x240   : > { %p1344_p12 = scmp.lt.u32.totalorder %s1342_s11, %s1338_s8  ;;  %p1346_p11 = scmp.lt.u32.totalorder %s1338_s8, %s1839_s29 }
 0x241   : > { %p1340_p6 = pnand %p1339_p5, %p1478_p4 }
 0x242   : > { %p1345_p10 = por %p1344_p12, %p1343_p9 }
 0x243   : > { %p1341_p7 = pneg %p1340_p6 }
 0x244   : > { %p1347_p13 = por %p1346_p11, %p1345_p10 }
 0x246   : > { %p1348_p0 = pnand %p1347_p13, %p1341_p7 }
 0x248   : > { %1351 = shalt.err (!%p1348_p0)
}
 0x249   : > { %s1411_s14 = smov 256   ;;  %s1412_s21 = smov 16  }
 0x24a   : > { %1244 = dma.vmem_to_hbm [thread:$0]  (%p1478_p4), %s1841_s22, 7168, %s1839_s29, %s1849_s18, %s1411_s14, %s1411_s14, %s1412_s21  }
 0x24b PF: > { %p1256_p1 = scmp.ge.s32.totalorder %s1406_s20, 2  ;;  %s989_s24 = sand.u32 1, %s1386_s15  }
 0x24c   : > { %s990_s26 = scalar_lea.sflag [#allocation3], %s989_s24 }
 0x24d   : > { %p1251_p2 = pnand %p1256_p1, %p1485_p8 }
 0x24f   : > { %1381 = dma.done.wait (!%p1251_p2), %s990_s26, 7168  }
 0x250   : > { %1383 = vsyncadd (!%p1251_p2), %s990_s26, 4294960128  ;;  %s18_s20 = sadd.s32 1, %s1406_s20   ;;  %s1904_s15 = smov %s1390_s16 }
 0x251   : > { %p15_p3 = scmp.ge.s32.totalorder %s18_s20, 5   ;;  %s1905_s16 = smov %s1394_s17 }
 0x252   : > { %s1906_s17 = smov %s1491_s28  ;;  %s1907_s18 = smov %s1402_s19 }
 0x253   : > { %s1908_s19 = smov %s1910_s23  ;;  %17 = sbr.rel (!%p15_p3) target bundleno = 5 (0x5), region = 79 }
 0x25a   :  { %995 = vsyncpa [#allocation3], 1 }
 0x25b   :  { %997 = vsyncpa [#allocation3 + $0x1], 1 }
 0x25c   :  { %998 = vsyncpa [#allocation4], 1 }
 0x25d   :  { %1000 = vsyncpa [#allocation4 + $0x1], 1 }

</bundles_post_ra>
